<compile_context>
chip_gen: v7x
topology: tpu7x:2x2x1
jax: 0.10.0
libtpu: 0.0.40
codegen_flags: <defaults>
</compile_context>

<pallas_src>
import functools

import jax
import jax.numpy as jnp
from jax import lax
from jax.experimental import pallas as pl
from jax.experimental.pallas import tpu as pltpu


# ---------------------------------------------------------------------------
# Kernel 1: M-tiled matmul + bias (stem: folded embedding Linear + 1x1 Conv1d)
# ---------------------------------------------------------------------------
def _linear_kernel(x_ref, w_ref, b_ref, o_ref):
    o_ref[...] = (
        jnp.dot(x_ref[...].astype(jnp.bfloat16), w_ref[...],
                preferred_element_type=jnp.float32)
        + b_ref[...]
    )


def linear(x, w, b, tm=256):
    """x: (M, K) f32, w: (K, N) bf16, b: (1, N) f32 -> (M, N) f32."""
    M, K = x.shape
    N = w.shape[1]
    if M % tm != 0:           # small / odd M: take the whole extent in one tile
        tm = M
    return pl.pallas_call(
        _linear_kernel,
        out_shape=jax.ShapeDtypeStruct((M, N), jnp.float32),
        grid=(M // tm,),
        in_specs=[
            pl.BlockSpec((tm, K), lambda i: (i, 0)),
            pl.BlockSpec((K, N), lambda i: (0, 0)),
            pl.BlockSpec((1, N), lambda i: (0, 0)),
        ],
        out_specs=pl.BlockSpec((tm, N), lambda i: (i, 0)),
        compiler_params=pltpu.CompilerParams(
            dimension_semantics=("parallel",),
        ),
    )(x, w, b)


# ---------------------------------------------------------------------------
# In-kernel helpers (traced inside the layer kernels)
# ---------------------------------------------------------------------------
def _attention(q, k, v, wo_ref, bo_ref, num_heads):
    """q: (Sq, d), k/v: (Skv, d) f32 -> attn output already projected, (Sq, d) f32."""
    Sq, d = q.shape
    hd = d // num_heads
    scale = float(hd) ** -0.5
    bf16 = jnp.bfloat16

    acc = jnp.zeros((Sq, d), jnp.float32)
    for h in range(num_heads):                       # static unrolled head loop
        lo = h * hd
        qh = (q[:, lo:lo + hd] * scale).astype(bf16)
        kh = k[:, lo:lo + hd].astype(bf16)
        vh = v[:, lo:lo + hd].astype(bf16)
        # q @ k^T without an explicit transpose: contract last dims of both.
        s = lax.dot_general(qh, kh, (((1,), (1,)), ((), ())),
                            preferred_element_type=jnp.float32)          # (Sq, Skv)
        s = s - jnp.max(s, axis=-1, keepdims=True)
        p = jnp.exp(s)
        p = p * pl.reciprocal(jnp.sum(p, axis=-1, keepdims=True), approx=True)
        ctx = jnp.dot(p.astype(bf16), vh,
                      preferred_element_type=jnp.float32)                # (Sq, hd)
        # Fold this head straight through its slice of the output projection.
        acc = acc + jnp.dot(ctx.astype(bf16), wo_ref[pl.ds(lo, hd), :],
                            preferred_element_type=jnp.float32)
    return acc + bo_ref[...]


def _layer_norm(y, g_ref, b_ref):
    mu = jnp.mean(y, axis=-1, keepdims=True)
    var = jnp.mean((y - mu) ** 2, axis=-1, keepdims=True)
    return (y - mu) * lax.rsqrt(var + 1e-5) * g_ref[...] + b_ref[...]


def _ffn(y, w1_ref, b1_ref, w2_ref, b2_ref):
    bf16 = jnp.bfloat16
    h1 = jnp.maximum(
        jnp.dot(y.astype(bf16), w1_ref[...],
                preferred_element_type=jnp.float32) + b1_ref[...],
        0.0,
    )
    return (jnp.dot(h1.astype(bf16), w2_ref[...],
                    preferred_element_type=jnp.float32) + b2_ref[...])


# ---------------------------------------------------------------------------
# Kernel 2: fused post-norm transformer encoder layer, per batch element.
#   src2 = MHA(src); src = LN1(src + src2); src2 = W2 relu(W1 src); src = LN2(src + src2)
# ---------------------------------------------------------------------------
def _transformer_layer_kernel(
    x_ref, wqkv_ref, bqkv_ref, wo_ref, bo_ref,
    g1_ref, be1_ref, w1_ref, b1_ref, w2_ref, b2_ref, g2_ref, be2_ref,
    o_ref, *, num_heads,
):
    x = x_ref[0]                                                       # (S, d) f32
    d = x.shape[-1]
    # Fused QKV projection: one MXU matmul instead of separate Q / KV matmuls.
    qkv = (jnp.dot(x.astype(jnp.bfloat16), wqkv_ref[...],
                   preferred_element_type=jnp.float32) + bqkv_ref[...])  # (S, 3d)
    attn = _attention(qkv[:, :d], qkv[:, d:2 * d], qkv[:, 2 * d:],
                      wo_ref, bo_ref, num_heads)
    y = _layer_norm(x + attn, g1_ref, be1_ref)
    z = _layer_norm(y + _ffn(y, w1_ref, b1_ref, w2_ref, b2_ref), g2_ref, be2_ref)
    o_ref[0] = z


# Last-layer specialization: only row 0 of the output is consumed downstream,
# so attention is computed for a single query row (full K/V), and the
# residual / LayerNorm / FFN run on that one row only.
def _transformer_last_layer_kernel(
    x_ref, wqkv_ref, bqkv_ref, wo_ref, bo_ref,
    g1_ref, be1_ref, w1_ref, b1_ref, w2_ref, b2_ref, g2_ref, be2_ref,
    o_ref, *, num_heads,
):
    x = x_ref[0]                                                       # (S, d)
    d = x.shape[-1]
    x0 = x[0:1, :]                                                     # (1, d)
    bf16 = jnp.bfloat16
    wqkv = wqkv_ref[...]
    bqkv = bqkv_ref[...]
    # Q only for the single consumed row; K/V over the full sequence.
    q = (jnp.dot(x0.astype(bf16), wqkv[:, :d],
                 preferred_element_type=jnp.float32) + bqkv[:, :d])     # (1, d)
    kv = (jnp.dot(x.astype(bf16), wqkv[:, d:],
                  preferred_element_type=jnp.float32) + bqkv[:, d:])    # (S, 2d)
    attn = _attention(q, kv[:, :d], kv[:, d:], wo_ref, bo_ref, num_heads)
    y = _layer_norm(x0 + attn, g1_ref, be1_ref)
    z = _layer_norm(y + _ffn(y, w1_ref, b1_ref, w2_ref, b2_ref), g2_ref, be2_ref)
    o_ref[0] = z                                                       # (1, d)


_LAYER_PARAM_NAMES = ("wqkv", "bqkv", "wo", "bo",
                      "g1", "be1", "w1", "b1", "w2", "b2", "g2", "be2")


def transformer_layer(x, p, num_heads, *, last=False):
    """x: (B, S, d) -> (B, S, d) [or (B, 1, d) for the last layer]."""
    B, S, d = x.shape
    out_s = 1 if last else S
    kernel_fn = _transformer_last_layer_kernel if last else _transformer_layer_kernel
    kernel = functools.partial(kernel_fn, num_heads=num_heads)

    def full_spec(a):
        return pl.BlockSpec(a.shape, lambda b: (0,) * a.ndim)

    in_specs = [pl.BlockSpec((1, S, d), lambda b: (b, 0, 0))]
    in_specs += [full_spec(p[n]) for n in _LAYER_PARAM_NAMES]

    return pl.pallas_call(
        kernel,
        out_shape=jax.ShapeDtypeStruct((B, out_s, d), jnp.float32),
        grid=(B,),
        in_specs=in_specs,
        out_specs=pl.BlockSpec((1, out_s, d), lambda b: (b, 0, 0)),
        compiler_params=pltpu.CompilerParams(
            dimension_semantics=("parallel",),
            # 32 MiB is a valid scoped-VMEM limit on v5e/v6e/v7x; bf16 weights for
            # the real config (~10 MiB resident) fit comfortably, toy shapes are tiny.
            vmem_limit_bytes=32 * 1024 * 1024,
        ),
    )(x, *(p[n] for n in _LAYER_PARAM_NAMES))


# ---------------------------------------------------------------------------
# Parameter construction (deterministic, synthetic)
# ---------------------------------------------------------------------------
def init_params(key, input_dim, n_features, dim, n_layers):
    def nrm(k, shape, scale=0.02):
        return (scale * jax.random.normal(k, shape)).astype(jnp.float32)

    keys = jax.random.split(key, 3 + n_layers)
    emb_w = nrm(keys[0], (input_dim, n_features))      # Linear(input_dim, n_features)
    emb_b = nrm(keys[1], (1, n_features))
    conv_w = nrm(keys[2], (n_features, dim))           # Conv1d(k=1, bias=False)

    # Fold Linear + 1x1 Conv (no nonlinearity between): x @ (We Wc) + be Wc.
    w_stem = (emb_w @ conv_w).astype(jnp.bfloat16)     # (input_dim, dim)
    b_stem = (emb_b @ conv_w).astype(jnp.float32)      # (1, dim)

    params = {"w_stem": w_stem, "b_stem": b_stem, "dim": dim, "layers": []}
    for li in range(n_layers):
        ks = jax.random.split(keys[3 + li], 10)
        wq = nrm(ks[0], (dim, dim))
        wk = nrm(ks[1], (dim, dim))
        wv = nrm(ks[2], (dim, dim))
        bq = nrm(ks[3], (1, dim))
        bk = nrm(ks[4], (1, dim))
        bv = nrm(ks[5], (1, dim))
        layer = {
            # Fused QKV projection (Q first so the last layer can slice it out).
            "wqkv": jnp.concatenate([wq, wk, wv], axis=1).astype(jnp.bfloat16),
            "bqkv": jnp.concatenate([bq, bk, bv], axis=1).astype(jnp.float32),
            "wo":  nrm(ks[6], (dim, dim)).astype(jnp.bfloat16),
            "bo":  nrm(ks[7], (1, dim)),
            "g1":  jnp.ones((1, dim), jnp.float32),
            "be1": jnp.zeros((1, dim), jnp.float32),
            # dim_feedforward = n_features (per the module __init__)
            "w1":  nrm(ks[8], (dim, n_features)).astype(jnp.bfloat16),
            "b1":  nrm(ks[9], (1, n_features)),
            "w2":  nrm(jax.random.fold_in(ks[9], 1), (n_features, dim)).astype(jnp.bfloat16),
            "b2":  nrm(jax.random.fold_in(ks[9], 2), (1, dim)),
            "g2":  jnp.ones((1, dim), jnp.float32),
            "be2": jnp.zeros((1, dim), jnp.float32),
        }
        params["layers"].append(layer)
    return params


# ---------------------------------------------------------------------------
# Full forward pass
# ---------------------------------------------------------------------------
def transformer_encoder_forward(x, params, num_heads):
    """x: (B, S, input_dim) f32 -> (B, dim) f32."""
    B, S, input_dim = x.shape
    dim = params["dim"]

    # Stem: folded (embedding Linear + pointwise Conv1d) in one tiled matmul.
    h = linear(x.reshape(B * S, input_dim), params["w_stem"], params["b_stem"])
    h = h.reshape(B, S, dim)

    n_layers = len(params["layers"])
    for i, layer_p in enumerate(params["layers"]):
        h = transformer_layer(h, layer_p, num_heads, last=(i == n_layers - 1))

    # torch: x.permute([2,0,1]) -> (S,B,D); transformer(x)[0] -> (B,D).
    return h[:, 0, :]


if __name__ == "__main__":
    # Small shapes consistent with the module (scaled down from 300/512/1024/4/2).
    B, S = 2, 8
    INPUT_DIM, N_FEATURES, DIM, N_HEAD, N_LAYERS = 32, 64, 128, 4, 2

    key = jax.random.PRNGKey(0)
    kx, kp = jax.random.split(key)
    x = jax.random.normal(kx, (B, S, INPUT_DIM), dtype=jnp.float32)
    params = init_params(kp, INPUT_DIM, N_FEATURES, DIM, N_LAYERS)

    out = transformer_encoder_forward(x, params, N_HEAD)
    out = jax.block_until_ready(out)
    assert out.shape == (B, DIM), out.shape
    assert jnp.all(jnp.isfinite(out))
    print("KERNEL_OK")
</pallas_src>

<mosaic_0001>
module attributes {stable_mosaic.version = 11 : i64} {
  func.func @_linear_kernel(%arg0: i32, %arg1: memref<16x32xf32, #tpu.memory_space<vmem>>, %arg2: memref<32x128xbf16, #tpu.memory_space<vmem>>, %arg3: memref<1x128xf32, #tpu.memory_space<vmem>>, %arg4: memref<16x128xf32, #tpu.memory_space<vmem>>) attributes {dimension_semantics = [#tpu.dimension_semantics<parallel>], iteration_bounds = array<i64: 1>, scalar_prefetch = 0 : i64, scratch_operands = 0 : i64, tpu.core_type = #tpu.core_type<tc>, window_params = [{transform_indices = @transform_0, window_bounds = array<i64: 16, 32>}, {pipeline_mode = #tpu.pipeline_mode<synchronous>, transform_indices = @transform_1, window_bounds = array<i64: 32, 128>}, {pipeline_mode = #tpu.pipeline_mode<synchronous>, transform_indices = @transform_2, window_bounds = array<i64: 1, 128>}, {transform_indices = @transform_3, window_bounds = array<i64: 16, 128>}]} {
    %c0 = arith.constant 0 : index
    %c0_0 = arith.constant 0 : index
    %0 = vector.load %arg1[%c0, %c0_0] : memref<16x32xf32, #tpu.memory_space<vmem>>, vector<16x32xf32>
    %1 = arith.truncf %0 : vector<16x32xf32> to vector<16x32xbf16>
    %c0_1 = arith.constant 0 : index
    %c0_2 = arith.constant 0 : index
    %2 = vector.load %arg2[%c0_1, %c0_2] : memref<32x128xbf16, #tpu.memory_space<vmem>>, vector<32x128xbf16>
    %cst = arith.constant dense<0.000000e+00> : vector<16x128xf32>
    %3 = tpu.matmul %1, %2, %cst {dimension_numbers = #tpu.dot_dimension_numbers<[1], [0], [0], [1], [0, 0, 1, 1], [], []>} : vector<16x32xbf16>, vector<32x128xbf16>, vector<16x128xf32> -> vector<16x128xf32>
    %c0_3 = arith.constant 0 : index
    %c0_4 = arith.constant 0 : index
    %4 = vector.load %arg3[%c0_3, %c0_4] : memref<1x128xf32, #tpu.memory_space<vmem>>, vector<1x128xf32>
    %5 = vector.broadcast %4 : vector<1x128xf32> to vector<16x128xf32>
    %6 = arith.addf %3, %5 : vector<16x128xf32>
    %c0_5 = arith.constant 0 : index
    %c0_6 = arith.constant 0 : index
    %7 = vector.load %arg4[%c0_5, %c0_6] : memref<16x128xf32, #tpu.memory_space<vmem>>, vector<16x128xf32>
    tpu.vector_store %arg4[%c0_5, %c0_6], %6 {strides = array<i32>} : memref<16x128xf32, #tpu.memory_space<vmem>>, vector<16x128xf32>,
    return
  }
  func.func @transform_0(%arg0: i32) -> (i32, i32) {
    %c0_i32 = arith.constant 0 : i32
    %c0_i32_0 = arith.constant 0 : i32
    return %arg0, %c0_i32 : i32, i32
  }
  func.func @transform_1(%arg0: i32) -> (i32, i32) {
    %c0_i32 = arith.constant 0 : i32
    %c0_i32_0 = arith.constant 0 : i32
    %c0_i32_1 = arith.constant 0 : i32
    return %c0_i32, %c0_i32_0 : i32, i32
  }
  func.func @transform_2(%arg0: i32) -> (i32, i32) {
    %c0_i32 = arith.constant 0 : i32
    %c0_i32_0 = arith.constant 0 : i32
    %c0_i32_1 = arith.constant 0 : i32
    return %c0_i32, %c0_i32_0 : i32, i32
  }
  func.func @transform_3(%arg0: i32) -> (i32, i32) {
    %c0_i32 = arith.constant 0 : i32
    %c0_i32_0 = arith.constant 0 : i32
    return %arg0, %c0_i32 : i32, i32
  }
}

</mosaic_0001>

<bundles_post_ra>
// kernel: tpu_custom_call.1
= control target key start
LH: loop header
LB: loop body
LE: loop exit
PB: predicated region body
PF: predicated region fallthrough
CT: control target
= control target key end

     0   :  { %8 = vsyncpa [#allocation3], 0  ;;  %s307_s0 = inlined_call_operand.hbm [shape: f32[16,32], index: 0, kind: input, shape index: {}]   ;;  %s308_s1 = inlined_call_operand.hbm [shape: bf16[32,128], index: 1, kind: input, shape index: {}]   ;;  %s309_s2 = inlined_call_operand.vmem [shape: f32[1,128], index: 2, kind: input, shape index: {}]   ;;  %s310_s3 = inlined_call_operand.hbm [shape: f32[16,128], index: 3, kind: output, shape index: {}]  }
   0x1   :  { %9 = vsyncpa [#allocation6], 0 }
   0x2   :  { %10 = vsyncpa [#allocation4], 0  ;;  %s233_s12 = smov [#allocation2]   ;;  %s161_s16 = scalar_lea.hbm %s307_s0, 256 }
   0x3   :  { %s16_s13 = sshll.u32 %s233_s12, 4  ;;  %p162_p0 = scmp.ne.s32.totalorder %s307_s0, %s161_s16  ;;  %s17_s13 = int_to_ptr.vmem [resolvable:$true] %s16_s13 }
   0x4   :  { %p165_p1 = scmp.lt.u32.totalorder %s161_s16, %s307_s0 }
   0x6   :  { %p167_p2 = pnand %p165_p1, %p162_p0 }
   0x8   :  { %170 = shalt.err (!%p167_p2)
}
   0x9   :  { %s171_s21 = scalar_lea.vmem %s17_s13, 256  ;;  %p176_p4 = scmp.lt.s32.totalorder %s17_s13, %s17_s13 }
   0xa   :  { %p172_p3 = scmp.ne.s32.totalorder %s17_s13, %s171_s21  ;;  %p177_p5 = scmp.lt.s32.totalorder %s171_s21, %s171_s21 }
   0xc   :  { %p178_p6 = por %p177_p5, %p176_p4 }
   0xe   :  { %p179_p7 = pnand %p178_p6, %p172_p3 }
  0x10   :  { %182 = shalt.err (!%p179_p7)
}
  0x11   :  { %s234_s22 = smov 128   ;;  %s235_s23 = smov 8  }
  0x12   :  { %22 = dma.hbm_to_vmem [thread:$0]  %s307_s0, 256, %s17_s13, [#allocation3], %s234_s22, %s234_s22, %s235_s23  }
  0x13   :  { %s236_s26 = smov [#allocation5]   ;;  %s183_s30 = scalar_lea.hbm %s308_s1, 256 }
  0x14   :  { %s28_s27 = sshll.u32 %s236_s26, 4  ;;  %p184_p8 = scmp.ne.s32.totalorder %s308_s1, %s183_s30  ;;  %s29_s27 = int_to_ptr.vmem [resolvable:$true] %s28_s27 }
  0x15   :  { %p187_p9 = scmp.lt.u32.totalorder %s183_s30, %s308_s1 }
  0x17   :  { %p189_p10 = pnand %p187_p9, %p184_p8 }
  0x19   :  { %192 = shalt.err (!%p189_p10)
}
  0x1a   :  { %s193_s8 = scalar_lea.vmem %s29_s27, 256  ;;  %p198_p12 = scmp.lt.s32.totalorder %s29_s27, %s29_s27 }
  0x1b   :  { %p194_p11 = scmp.ne.s32.totalorder %s29_s27, %s193_s8  ;;  %p199_p13 = scmp.lt.s32.totalorder %s193_s8, %s193_s8 }
  0x1d   :  { %p200_p0 = por %p199_p13, %p198_p12 }
  0x1f   :  { %p201_p1 = pnand %p200_p0, %p194_p11 }
  0x21   :  { %204 = shalt.err (!%p201_p1)
}
  0x22   :  { %s237_s0 = smov 64   ;;  %s238_s9 = smov 4  }
  0x23   :  { %34 = dma.hbm_to_vmem [thread:$0]  %s308_s1, 256, %s29_s27, [#allocation6], %s237_s0, %s237_s0, %s238_s9  }
  0x24   :  { %227 = dma.done.wait [#allocation3], 256  }
  0x25   :  { %228 = vsyncadd [#allocation3], 4294967040 }
  0x26   :  { %229 = dma.done.wait [#allocation6], 256  }
  0x27   :  { %230 = vsyncadd [#allocation6], 4294967040  ;;  %v239_v0 = vmov 0.0   ;;  %vm240_vm0 = vmmov 0   ;;  %v159_v1 = vld [vmem:[#allocation5] sm:$0xff]   ;;  %v160_v2 = vld [vmem:[#allocation5 + $0x8] sm:$0xff]  }
  0x28   :  { %142 = vmatprep.subr.bf16.mxu0 %v239_v0  ;;  %146 = vmatprep.mubr.msk.bf16.mxu0 %vm240_vm0, %v239_v0  ;;  %v44_v3 = vld [vmem:[#allocation2] sm:$0xff]  ;;  %v45_v4 = vld [vmem:[#allocation2 + $0x8] sm:$0xff]  ;;  %vm70_vm1 = vcmask 261120   ;;  %s241_s13 = smov [#allocation7]  }
  0x29   :  { %143 = vmatpush3.bf16.msra.mxu0 %v159_v1  ;;  %v46_v5 = vpack.c.bf16 %v45_v4, %v44_v3  ;;  %v135_v6 = vld [vmem:[%s309_s2] ss:$0 sm:$0xff]  ;;  %s122_s14 = sshll.u32 %s241_s13, 4  ;;  %s123_s14 = int_to_ptr.vmem [resolvable:$true] %s122_s14 }
  0x2a   :  { %144 = vmatprep.subr.bf16.mxu0 %v239_v0  ;;  %s205_s15 = scalar_lea.vmem %s123_s14, 256  ;;  %p210_p3 = scmp.lt.s32.totalorder %s123_s14, %s123_s14 }
  0x2b   :  { %p206_p2 = scmp.ne.s32.totalorder %s123_s14, %s205_s15  ;;  %p211_p4 = scmp.lt.s32.totalorder %s205_s15, %s205_s15 }
  0x2d   :  { %145 = vmatpush3.bf16.msra.mxu0 %v160_v2  ;;  %p212_p5 = por %p211_p4, %p210_p3 }
  0x2f   :  { %p213_p6 = pnand %p212_p5, %p206_p2 }
  0x30   :  { %147 = vmatmul.mubr.msk.bf16.vlgmr.msra.gmra.mrb[0].mxu0 %vm70_vm1, %v46_v5 }
 0x103   :  { %v108_v7 = vpop.f32.mrb[0].mxu0 }
 0x104   :  { %v109_v8 = vadd.f32 %v135_v6, %v108_v7  ;;  %v148_v9 = vpop.f32.mrb[1].mxu0 }
 0x105   :  { %v111_v10 = vpop.f32.mrb[2].mxu0 }
 0x106   :  { %115 = vst [vmem:[#allocation7] sm:$0xff] %v109_v8  ;;  %v112_v11 = vadd.f32 %v135_v6, %v111_v10  ;;  %v149_v12 = vpop.f32.mrb[3].mxu0 }
 0x108   :  { %116 = vst [vmem:[#allocation7 + $0x8] sm:$0xff] %v112_v11 }
 0x109   :  { %216 = shalt.err (!%p213_p6)
}
 0x10a   :  { %s217_s17 = scalar_lea.hbm %s310_s3, 256 }
 0x10b   :  { %p218_p7 = scmp.ne.s32.totalorder %s310_s3, %s217_s17  ;;  %p221_p8 = scmp.lt.u32.totalorder %s217_s17, %s310_s3 }
 0x10d   :  { %p223_p9 = pnand %p221_p8, %p218_p7 }
 0x10f   :  { %226 = shalt.err (!%p223_p9)
}
 0x110   :  { %128 = dma.vmem_to_hbm [thread:$0]  %s123_s14, 256, %s310_s3, [#allocation4], %s234_s22, %s234_s22, %s235_s23  }
 0x111   :  { %231 = dma.done.wait [#allocation4], 256  }
 0x112   :  { %232 = vsyncadd [#allocation4], 4294967040 }
 0x113   :  { %132 = vsyncpa [#allocation3], 1 }
 0x114   :  { %133 = vsyncpa [#allocation6], 1 }
 0x115   :  { %134 = vsyncpa [#allocation4], 1 }

</bundles_post_ra>
